<compile_context>
chip_gen: v7x
topology: tpu7x:2x2x1
jax: 0.10.0
libtpu: 0.0.40
codegen_flags: <defaults>
</compile_context>

<pallas_src>
import math

import jax
import jax.numpy as jnp
import numpy as np
from jax.experimental import pallas as pl
from jax.experimental.pallas import tpu as pltpu


# ---------------------------------------------------------------------------
# "Module init": build the PE table once, sqrt(d_model) already folded in.
# ---------------------------------------------------------------------------
def build_pe(max_seq_len: int, d_model: int) -> np.ndarray:
    """Replicates the PyTorch __init__ loop exactly:
         pe[pos, i]     = sin(pos / 10000 ** (2 * i       / d_model))  (even i)
         pe[pos, i + 1] = cos(pos / 10000 ** (2 * (i + 1) / d_model))  (odd i+1)
       i.e. each channel c uses exponent 2*c/d_model with its own index c."""
    assert d_model % 2 == 0, "APE reference indexes i+1 -> d_model must be even"
    pos = np.arange(max_seq_len, dtype=np.float64)[:, None]
    ch = np.arange(d_model, dtype=np.float64)[None, :]
    ang = pos / (10000.0 ** (2.0 * ch / d_model))
    return np.where(ch % 2 == 0, np.sin(ang), np.cos(ang)).astype(np.float32)


def build_pe_scaled(max_seq_len: int, d_model: int) -> np.ndarray:
    """pe * sqrt(d_model), computed once so the kernel is a pure add."""
    return (build_pe(max_seq_len, d_model) * np.float32(math.sqrt(d_model))).astype(
        np.float32
    )


# ---------------------------------------------------------------------------
# Kernel body: one lane-dense tile of  y = x + pe_scaled  (add done in f32).
# ---------------------------------------------------------------------------
def _ape_kernel(x_ref, pe_ref, o_ref):
    # x_ref: (TB, LT), pe_ref: (1, LT) float32, o_ref: (TB, LT)
    # TODO(synk): for sub-f32 activations PyTorch promotes the *output* to f32;
    # here the add is done in f32 and the result is cast back to x.dtype.
    o_ref[...] = (x_ref[...].astype(jnp.float32) + pe_ref[...]).astype(o_ref.dtype)


_TARGET_TILE_BYTES = 4 * 1024 * 1024  # per-buffer tile budget (~4 MiB)
_MIN_SPLIT_BYTES = 1 * 1024 * 1024    # below this a single grid step is fine


def _vmem_cap_bytes() -> int:
    """~3/4 of physical VMEM (generation-aware: ~48 MiB v7x, ~96 MiB v5e/v6e)."""
    try:
        phys = int(pltpu.get_tpu_info().vmem_capacity_bytes)
    except Exception:
        phys = 64 * 1024 * 1024  # conservative fallback (v7x physical per-TC)
    return (phys * 3) // 4


def ape_forward(x: jax.Array, pe_scaled: jax.Array) -> jax.Array:
    """x: (B, S, D); pe_scaled: (max_seq_len, D) float32, already * sqrt(D)."""
    B, S, D = x.shape
    max_len, d_model = pe_scaled.shape
    assert D == d_model
    assert S <= max_len

    SD = S * D
    itemsize = jnp.dtype(x.dtype).itemsize
    sub_mult = max(8, 32 // itemsize)        # packed-sublane multiple per dtype
    row_bytes = SD * itemsize
    total_bytes = B * row_bytes

    # Lane-dense 2-D views (bitcast-level reshapes for row-major contiguous x).
    x2d = x.reshape(B, SD)
    pe2d = pe_scaled[:S, :].reshape(1, SD)   # kept in f32; add happens in f32

    # ---- rows-first tiling: every branch guarantees tb*lt*itemsize <= budget.
    if total_bytes <= _TARGET_TILE_BYTES:
        tb, lt = B, SD                                            # one tile
    elif sub_mult * row_bytes <= _TARGET_TILE_BYTES:
        lt = SD                                                   # full rows
        tb = (_TARGET_TILE_BYTES // row_bytes) // sub_mult * sub_mult
        tb = min(max(tb, sub_mult), B)
    else:
        # Even a minimal row-slab exceeds the budget: tile the lane axis too.
        tb = min(B, sub_mult)
        lt = (_TARGET_TILE_BYTES // (tb * itemsize)) // 128 * 128
        lt = min(max(lt, 512), SD)           # keep lane extent >= 512 lanes

    # ---- guarantee >=2 grid steps for v7x megacore on non-trivial problems.
    if (pl.cdiv(B, tb) * pl.cdiv(SD, lt) == 1) and total_bytes >= _MIN_SPLIT_BYTES:
        if B >= 2 * sub_mult:
            tb = max(sub_mult, (B // 2 // sub_mult) * sub_mult)
        elif SD >= 256:
            lt = max(128, (((SD + 1) // 2) + 127) // 128 * 128)

    row_tiles = pl.cdiv(B, tb)
    lane_tiles = pl.cdiv(SD, lt)

    # Explicit VMEM limit: double-buffered x + out tiles plus the pe tile,
    # with headroom; capped generation-aware (never above ~3/4 physical VMEM).
    tile_bytes = tb * lt * itemsize
    footprint = 4 * tile_bytes + 2 * lt * 4
    vmem_limit = int(min(_vmem_cap_bytes(), max(footprint + (4 << 20), 16 << 20)))

    # Grid order (lane, row): pe's block index (0, j) depends only on the outer
    # axis, so the pe tile stays resident across the entire inner row loop.
    grid = (lane_tiles, row_tiles)

    y2d = pl.pallas_call(
        _ape_kernel,
        out_shape=jax.ShapeDtypeStruct((B, SD), x.dtype),
        grid_spec=pl.GridSpec(
            grid=grid,
            in_specs=[
                pl.BlockSpec((tb, lt), lambda j, i: (i, j)),   # x tile
                pl.BlockSpec((1, lt), lambda j, i: (0, j)),    # pe tile (f32)
            ],
            out_specs=pl.BlockSpec((tb, lt), lambda j, i: (i, j)),
        ),
        input_output_aliases={0: 0},   # y reuses x's buffer when x is donated
        compiler_params=pltpu.CompilerParams(
            dimension_semantics=("parallel", "parallel"),
            vmem_limit_bytes=vmem_limit,
        ),
    )(x2d, pe2d)

    return y2d.reshape(B, S, D)


# Donate x so the input/output aliasing actually reuses the HBM allocation.
ape_forward_jit = jax.jit(ape_forward, donate_argnums=(0,))


if __name__ == "__main__":
    # Small shapes consistent with the module: batch=2, seq=8, d_model=32.
    B, S, D = 2, 8, 32
    MAX_SEQ_LEN = 80

    key = jax.random.PRNGKey(0)
    x = jax.random.normal(key, (B, S, D), dtype=jnp.float32)

    # 'Module init': buffer built once with sqrt(d_model) folded in.
    pe_scaled = jnp.asarray(build_pe_scaled(MAX_SEQ_LEN, D))

    # Reference (plain JAX, matches PyTorch semantics) BEFORE donating x.
    pe_ref = jnp.asarray(build_pe(MAX_SEQ_LEN, D))
    y_ref = jax.block_until_ready(x + pe_ref[None, :S, :] * math.sqrt(D))

    y = ape_forward_jit(x, pe_scaled)
    y = jax.block_until_ready(y)

    np.testing.assert_allclose(np.asarray(y), np.asarray(y_ref), rtol=1e-6, atol=1e-6)
    print("KERNEL_OK")
</pallas_src>

<mosaic_0001>
module attributes {stable_mosaic.version = 11 : i64} {
  func.func @_ape_kernel(%arg0: i32, %arg1: i32, %arg2: memref<2x256xf32, #tpu.memory_space<vmem>>, %arg3: memref<1x256xf32, #tpu.memory_space<vmem>>, %arg4: memref<2x256xf32, #tpu.memory_space<vmem>>) attributes {dimension_semantics = [#tpu.dimension_semantics<parallel>, #tpu.dimension_semantics<parallel>], iteration_bounds = array<i64: 1, 1>, scalar_prefetch = 0 : i64, scratch_operands = 0 : i64, tpu.core_type = #tpu.core_type<tc>, window_params = [{transform_indices = @transform_0, window_bounds = array<i64: 2, 256>}, {transform_indices = @transform_1, window_bounds = array<i64: 1, 256>}, {transform_indices = @transform_2, window_bounds = array<i64: 2, 256>}]} {
    %c0 = arith.constant 0 : index
    %c0_0 = arith.constant 0 : index
    %0 = vector.load %arg2[%c0, %c0_0] : memref<2x256xf32, #tpu.memory_space<vmem>>, vector<2x256xf32>
    %c0_1 = arith.constant 0 : index
    %c0_2 = arith.constant 0 : index
    %1 = vector.load %arg3[%c0_1, %c0_2] : memref<1x256xf32, #tpu.memory_space<vmem>>, vector<1x256xf32>
    %2 = vector.broadcast %1 : vector<1x256xf32> to vector<2x256xf32>
    %3 = arith.addf %0, %2 : vector<2x256xf32>
    %c0_3 = arith.constant 0 : index
    %c0_4 = arith.constant 0 : index
    %4 = vector.load %arg4[%c0_3, %c0_4] : memref<2x256xf32, #tpu.memory_space<vmem>>, vector<2x256xf32>
    tpu.vector_store %arg4[%c0_3, %c0_4], %3 {strides = array<i32>} : memref<2x256xf32, #tpu.memory_space<vmem>>, vector<2x256xf32>,
    return
  }
  func.func @transform_0(%arg0: i32, %arg1: i32) -> (i32, i32) {
    %c0_i32 = arith.constant 0 : i32
    return %arg1, %arg0 : i32, i32
  }
  func.func @transform_1(%arg0: i32, %arg1: i32) -> (i32, i32) {
    %c0_i32 = arith.constant 0 : i32
    %c0_i32_0 = arith.constant 0 : i32
    return %c0_i32, %arg0 : i32, i32
  }
  func.func @transform_2(%arg0: i32, %arg1: i32) -> (i32, i32) {
    %c0_i32 = arith.constant 0 : i32
    return %arg1, %arg0 : i32, i32
  }
}

</mosaic_0001>

<bundles_post_ra>
// kernel: ape_forward.1
= control target key start
LH: loop header
LB: loop body
LE: loop exit
PB: predicated region body
PF: predicated region fallthrough
CT: control target
= control target key end

     0   :  { %v14_v0 = vlaneseq  ;;  %v38_v1 = vmov 1983009808   ;;  %s63_s1 = inlined_call_operand.vmem [shape: f32[1,256], index: 1, kind: input, shape index: {}]   ;;  %s64_s0 = inlined_call_operand.vmem [shape: f32[2,256], index: 0, kind: input, shape index: {}, may-alias: {0,2}]   ;;  %s65_s2 = inlined_call_operand.vmem [shape: f32[2,256], index: 2, kind: output, shape index: {}, may-alias: {0,2}]  }
   0x1   :  { %v24_v2 = vunpack.c.l.s4 %v38_v1  ;;  %v12_v4 = vld [vmem:[%s63_s1] sm:$0x3] }
   0x2   :  { %v15_v3 = vshrl.u32 %v14_v0, 7  ;;  %v11_v12 = vld [vmem:[%s64_s0] sm:$0xf] }
   0x3   :  { %v25_v5 = vunpack.c.0.s8 %v24_v2 }
   0x4   :  { %v16_v6 = vsub.s32 0, %v15_v3  ;;  %v20_v7 = vsub.s32 1, %v15_v3 }
   0x5   :  { %v28_v10 = vsub.s32 %v25_v5, %v15_v3 }
   0x6   :  { %v17_v8 = vrot.slane %v12_v4, %v16_v6  ;;  %v21_v9 = vrot.slane %v12_v4, %v20_v7 }
   0x8   :  { %v22_v11 = vcombine.low %v17_v8, %v21_v9 }
   0xa   :  { %v29_v13 = vrot.slane %v22_v11, %v28_v10 }
   0xc   :  { %v31_v14 = vadd.f32 %v29_v13, %v11_v12 }
   0xe   :  { %32 = vst [vmem:[%s65_s2] sm:$0xf] %v31_v14 }

</bundles_post_ra>
